<compile_context>
chip_gen: v7x
topology: tpu7x:2x2x1
jax: 0.10.0
libtpu: 0.0.40
codegen_flags: <defaults>
</compile_context>

<pallas_src>
import jax
import jax.numpy as jnp
from jax.experimental import pallas as pl
from jax.experimental.pallas import tpu as pltpu

# ---------------- problem sizes ----------------
BATCH = 8
X_DIM = 32          # encoder_layer_sizes_q[0]
HQ_DIM = 32         # encoder_layer_sizes_q[1]
C_DIM = 16          # encoder_layer_sizes_p[-1] (MLP_p is empty when not conditional)
LATENT = 16         # latent_size
HD_DIM = 32         # decoder_layer_sizes[0]
OUT_DIM = 32        # decoder_layer_sizes[1]
TEMPERATURE = 0.67

# Packed layouts (all f32):
#   input slab  (B, 64):   [ x(32) | c(16) | gumbel(16) ]
#   weight slab (128, 48): rows [ W1(48)=[[wq0,0],[0,wlp]] | wlq(32) | wd0(16) | wd1(32) ]
#   bias slab   (1, 128):  [ bq0(32) | blq(16) | blp(16) | bd0(32) | bd1(32) ]
#   output slab (B, 128):  [ recon(32) | alpha_q(16) | alpha_p(16) | alpha_p_sm(16)
#                            | z(16) | pad(32) ]
W_COLS = 48


# ---------------- in-kernel math helpers ----------------
def _softmax(x):
    m = jnp.max(x, axis=-1, keepdims=True)
    e = jnp.exp(x - m)
    return e / jnp.sum(e, axis=-1, keepdims=True)          # exact division (VPU slot is idle)


def _sigmoid(x):
    # Overflow-free, EUP (tanh) based sigmoid.
    return 0.5 * (1.0 + jnp.tanh(0.5 * x))


def _sparsemax16(z):
    """Exact sparsemax over the last axis for K=16 (Martins & Astudillo), sort-free/loop-free.

    For each element i compute k_i = #{j : z_j >= z_i} and S_i = sum_{j : z_j >= z_i} z_j via
    15 static logical lane-rolls (built from a doubled slab + static lane slices, so every op
    stays 2-D and data-independent). Element i is in the support iff 1 + k_i*z_i > S_i
    (ties never straddle the support boundary), giving the exact tau in closed form.
    """
    zz = jnp.concatenate([z, z], axis=-1)                   # (B, 32) doubled slab
    k = jnp.ones_like(z)                                    # shift 0: z_i >= z_i always
    s = z
    for shift in range(1, LATENT):                          # 15 independent rolls -> pipeline
        zr = zz[:, shift:shift + LATENT]                    # logical roll by `shift`
        ge = zr >= z
        k = k + jnp.where(ge, 1.0, 0.0)
        s = s + jnp.where(ge, zr, 0.0)
    in_supp = jnp.where(1.0 + k * z > s, 1.0, 0.0)
    ksupp = jnp.sum(in_supp, axis=-1, keepdims=True)        # >= 1 always
    ssupp = jnp.sum(z * in_supp, axis=-1, keepdims=True)
    tau = (ssupp - 1.0) / ksupp                             # exact division
    return jnp.maximum(z - tau, 0.0)


# ---------------- the kernel ----------------
def vae_fwd_kernel(inp_ref, w_ref, b_ref, out_ref):
    f32 = jnp.float32

    # ----- unpack activation slab -----
    inp = inp_ref[...]                                      # (B, 64)
    xc = inp[:, 0:X_DIM + C_DIM]                            # (B, 48) = [x | c]
    g = inp[:, X_DIM + C_DIM:X_DIM + C_DIM + LATENT]        # (B, 16) Gumbel noise

    # ----- unpack bias slab -----
    b = b_ref[...]                                          # (1, 128)
    bq0 = b[:, 0:32]
    blq = b[:, 32:48]
    blp = b[:, 48:64]
    bd0 = b[:, 64:96]
    bd1 = b[:, 96:128]

    # ----- unpack weight slab (static sublane slices at multiples of 8) -----
    w1 = w_ref[0:48, 0:48]                                  # fused [wq0 | wlp] block weight
    wlq = w_ref[48:80, 0:16]
    wd0 = w_ref[80:96, 0:32]
    wd1 = w_ref[96:128, 0:32]

    # ----- mm1: fused q-hidden + p-latent projection in ONE matmul -----
    m1 = jnp.dot(xc, w1, preferred_element_type=f32)        # (B, 48)
    alpha_p_lin = m1[:, HQ_DIM:HQ_DIM + LATENT] + blp       # ready right after mm1
    h_q = jnp.maximum(m1[:, 0:HQ_DIM] + bq0, 0.0)           # (B, 32)

    # ----- p branch: softmax + exact sparsemax (overlaps the q/decoder matmul chain) -----
    alpha_p = _softmax(alpha_p_lin)
    alpha_p_sm = _sparsemax16(alpha_p_lin)

    # ----- q branch: latent projection, softmax, Gumbel-Softmax sample -----
    alpha_q_lin = jnp.dot(h_q, wlq, preferred_element_type=f32) + blq   # (B, 16)
    alpha_q = _softmax(alpha_q_lin)
    z = _softmax((alpha_q_lin + g) * (1.0 / TEMPERATURE))

    # ----- Decoder: Linear + ReLU, Linear + Sigmoid -----
    h_d = jnp.maximum(jnp.dot(z, wd0, preferred_element_type=f32) + bd0, 0.0)
    recon = _sigmoid(jnp.dot(h_d, wd1, preferred_element_type=f32) + bd1)

    # ----- lane sub-range stores into the single lane-dense (B,128) output tile -----
    bsz = recon.shape[0]
    out_ref[:, 0:32] = recon
    out_ref[:, 32:48] = alpha_q
    out_ref[:, 48:64] = alpha_p
    out_ref[:, 64:80] = alpha_p_sm
    out_ref[:, 80:96] = z
    out_ref[:, 96:128] = jnp.zeros((bsz, 32), f32)          # keep the pad deterministic


# ---------------- parameter packing (done ONCE at init, not per call) ----------------
def pack_params(params):
    f32 = jnp.float32
    # Fused first-matmul weight: [x | c] @ W1 = [h_q_pre | alpha_p_lin_pre].
    w1 = jnp.zeros((X_DIM + C_DIM, HQ_DIM + LATENT), f32)                 # (48, 48)
    w1 = w1.at[0:X_DIM, 0:HQ_DIM].set(params["wq0"])
    w1 = w1.at[X_DIM:X_DIM + C_DIM, HQ_DIM:HQ_DIM + LATENT].set(params["wlp"])

    def pad_cols(w):
        return jnp.pad(w, ((0, 0), (0, W_COLS - w.shape[1])))

    w_slab = jnp.concatenate(
        [w1, pad_cols(params["wlq"]), pad_cols(params["wd0"]), pad_cols(params["wd1"])],
        axis=0).astype(f32)                                               # (128, 48)
    b_slab = jnp.concatenate(
        [params["bq0"], params["blq"], params["blp"], params["bd0"], params["bd1"]],
        axis=-1).astype(f32)                                              # (1, 128)
    return {"w_slab": w_slab, "b_slab": b_slab}


# ---------------- wrapper ----------------
@jax.jit
def vae_forward_packed(x, c, gumbel, w_slab, b_slab):
    B = x.shape[0]
    inp = jnp.concatenate([x, c, gumbel], axis=-1)          # (B, 64), fused by XLA under jit

    vmem = pl.BlockSpec(memory_space=pltpu.MemorySpace.VMEM)
    out = pl.pallas_call(
        vae_fwd_kernel,
        out_shape=jax.ShapeDtypeStruct((B, 128), jnp.float32),
        in_specs=[vmem, vmem, vmem],
        out_specs=vmem,
    )(inp, w_slab, b_slab)

    recon      = out[:, 0:32]
    alpha_q    = out[:, 32:48]
    alpha_p    = out[:, 48:64]
    alpha_p_sm = out[:, 64:80]
    z          = out[:, 80:96]
    return recon, alpha_q, alpha_p, alpha_p_sm, z


def vae_forward(x, c, gumbel, packed, params):
    recon, alpha_q, alpha_p, alpha_p_sm, z = vae_forward_packed(
        x, c, gumbel, packed["w_slab"], packed["b_slab"])
    feats = c                       # MLP_p is empty when not conditional -> identity
    lin_q = (params["wlq"], params["blq"])   # PyTorch returns the nn.Linear modules
    lin_p = (params["wlp"], params["blp"])
    return recon, alpha_q, alpha_p, alpha_p_sm, lin_q, lin_p, z, feats


# ---------------- pure-JAX reference (for correctness check only) ----------------
def _ref_sparsemax(z):
    zs = jnp.sort(z, axis=-1)[:, ::-1]
    cs = jnp.cumsum(zs, axis=-1)
    kk = jnp.arange(1, z.shape[-1] + 1, dtype=z.dtype)
    cond = 1.0 + kk * zs > cs
    k = jnp.sum(cond, axis=-1, keepdims=True)
    cs_k = jnp.take_along_axis(cs, (k - 1).astype(jnp.int32), axis=-1)
    tau = (cs_k - 1.0) / k
    return jnp.maximum(z - tau, 0.0)


def ref_forward(x, c, gumbel, params):
    hp = jax.lax.Precision.HIGHEST
    h_q = jnp.maximum(jnp.dot(x, params["wq0"], precision=hp) + params["bq0"], 0.0)
    alpha_q_lin = jnp.dot(h_q, params["wlq"], precision=hp) + params["blq"]
    alpha_p_lin = jnp.dot(c, params["wlp"], precision=hp) + params["blp"]
    alpha_q = jax.nn.softmax(alpha_q_lin, axis=-1)
    alpha_p = jax.nn.softmax(alpha_p_lin, axis=-1)
    alpha_p_sm = _ref_sparsemax(alpha_p_lin)
    z = jax.nn.softmax((alpha_q_lin + gumbel) / TEMPERATURE, axis=-1)
    h_d = jnp.maximum(jnp.dot(z, params["wd0"], precision=hp) + params["bd0"], 0.0)
    recon = 0.5 * (1.0 + jnp.tanh(0.5 * (jnp.dot(h_d, params["wd1"], precision=hp)
                                         + params["bd1"])))
    return recon, alpha_q, alpha_p, alpha_p_sm, z


def init_params(key):
    def linear(k, d_in, d_out):
        kw, kb = jax.random.split(k)
        w = jax.random.normal(kw, (d_in, d_out), jnp.float32) * 0.1   # [in, out]
        b = jax.random.normal(kb, (1, d_out), jnp.float32) * 0.01
        return w, b

    keys = jax.random.split(key, 5)
    wq0, bq0 = linear(keys[0], X_DIM, HQ_DIM)
    wlq, blq = linear(keys[1], HQ_DIM, LATENT)
    wlp, blp = linear(keys[2], C_DIM, LATENT)
    wd0, bd0 = linear(keys[3], LATENT, HD_DIM)
    wd1, bd1 = linear(keys[4], HD_DIM, OUT_DIM)
    return dict(wq0=wq0, bq0=bq0, wlq=wlq, blq=blq, wlp=wlp, blp=blp,
                wd0=wd0, bd0=bd0, wd1=wd1, bd1=bd1)


if __name__ == "__main__":
    root = jax.random.PRNGKey(0)
    k_param, k_x, k_c, k_g = jax.random.split(root, 4)

    params = init_params(k_param)
    packed = pack_params(params)              # hoisted: packed once, reused every call

    x = jax.random.normal(k_x, (BATCH, X_DIM), jnp.float32)
    c = jax.random.normal(k_c, (BATCH, C_DIM), jnp.float32)
    u = jax.random.uniform(k_g, (BATCH, LATENT), jnp.float32, minval=1e-6, maxval=1.0 - 1e-6)
    gumbel = -jnp.log(-jnp.log(u))            # deterministic Gumbel(0,1) noise for sample_q

    outs = vae_forward(x, c, gumbel, packed, params)
    outs = jax.block_until_ready(outs)
    recon_x, alpha_q, alpha_p, alpha_p_sm, lin_q, lin_p, z, feats = outs

    # ----- sanity checks -----
    assert recon_x.shape == (BATCH, OUT_DIM)
    assert alpha_q.shape == (BATCH, LATENT) and alpha_p.shape == (BATCH, LATENT)
    assert alpha_p_sm.shape == (BATCH, LATENT)
    assert z.shape == (BATCH, LATENT) and feats.shape == (BATCH, C_DIM)
    assert bool(jnp.all(jnp.isfinite(recon_x)))
    # exact-division distributions sum to 1 tightly now
    assert bool(jnp.allclose(jnp.sum(alpha_q, -1), 1.0, atol=1e-5))
    assert bool(jnp.allclose(jnp.sum(alpha_p, -1), 1.0, atol=1e-5))
    assert bool(jnp.allclose(jnp.sum(alpha_p_sm, -1), 1.0, atol=1e-5))
    assert bool(jnp.allclose(jnp.sum(z, -1), 1.0, atol=1e-5))
    assert bool(jnp.all(alpha_p_sm >= 0.0))
    assert bool(jnp.allclose(feats, c, atol=1e-6))

    # ----- numerical check against a pure-JAX reference -----
    ref = ref_forward(x, c, gumbel, params)
    for name, got, want in zip(
            ("recon", "alpha_q", "alpha_p", "alpha_p_sparsemax", "z"),
            (recon_x, alpha_q, alpha_p, alpha_p_sm, z), ref):
        assert bool(jnp.allclose(got, want, atol=1e-3, rtol=1e-3)), name

    print("KERNEL_OK")
</pallas_src>

<mosaic_0001>
module attributes {stable_mosaic.version = 11 : i64} {
  func.func @vae_fwd_kernel(%arg0: memref<8x64xf32, #tpu.memory_space<vmem>>, %arg1: memref<128x48xf32, #tpu.memory_space<vmem>>, %arg2: memref<1x128xf32, #tpu.memory_space<vmem>>, %arg3: memref<8x128xf32, #tpu.memory_space<vmem>>) attributes {dimension_semantics = [], scalar_prefetch = 0 : i64, scratch_operands = 0 : i64, tpu.core_type = #tpu.core_type<tc>} {
    %c0 = arith.constant 0 : index
    %c0_0 = arith.constant 0 : index
    %0 = vector.load %arg0[%c0, %c0_0] : memref<8x64xf32, #tpu.memory_space<vmem>>, vector<8x64xf32>
    %1 = vector.extract_strided_slice %0 {offsets = [0, 0], sizes = [8, 48], strides = [1, 1]} : vector<8x64xf32> to vector<8x48xf32>
    %2 = vector.extract_strided_slice %0 {offsets = [0, 48], sizes = [8, 16], strides = [1, 1]} : vector<8x64xf32> to vector<8x16xf32>
    %c0_1 = arith.constant 0 : index
    %c0_2 = arith.constant 0 : index
    %3 = vector.load %arg2[%c0_1, %c0_2] : memref<1x128xf32, #tpu.memory_space<vmem>>, vector<1x128xf32>
    %4 = vector.extract_strided_slice %3 {offsets = [0, 0], sizes = [1, 32], strides = [1, 1]} : vector<1x128xf32> to vector<1x32xf32>
    %5 = vector.extract_strided_slice %3 {offsets = [0, 32], sizes = [1, 16], strides = [1, 1]} : vector<1x128xf32> to vector<1x16xf32>
    %6 = vector.extract_strided_slice %3 {offsets = [0, 48], sizes = [1, 16], strides = [1, 1]} : vector<1x128xf32> to vector<1x16xf32>
    %7 = vector.extract_strided_slice %3 {offsets = [0, 64], sizes = [1, 32], strides = [1, 1]} : vector<1x128xf32> to vector<1x32xf32>
    %8 = vector.extract_strided_slice %3 {offsets = [0, 96], sizes = [1, 32], strides = [1, 1]} : vector<1x128xf32> to vector<1x32xf32>
    %c0_3 = arith.constant 0 : index
    %c0_4 = arith.constant 0 : index
    %9 = vector.load %arg1[%c0_3, %c0_4] : memref<128x48xf32, #tpu.memory_space<vmem>>, vector<48x48xf32>
    %c48 = arith.constant 48 : index
    %c0_5 = arith.constant 0 : index
    %10 = vector.load %arg1[%c48, %c0_5] : memref<128x48xf32, #tpu.memory_space<vmem>>, vector<32x16xf32>
    %c80 = arith.constant 80 : index
    %c0_6 = arith.constant 0 : index
    %11 = vector.load %arg1[%c80, %c0_6] : memref<128x48xf32, #tpu.memory_space<vmem>>, vector<16x32xf32>
    %c96 = arith.constant 96 : index
    %c0_7 = arith.constant 0 : index
    %12 = vector.load %arg1[%c96, %c0_7] : memref<128x48xf32, #tpu.memory_space<vmem>>, vector<32x32xf32>
    %cst = arith.constant dense<0.000000e+00> : vector<8x48xf32>
    %13 = tpu.matmul %1, %9, %cst {dimension_numbers = #tpu.dot_dimension_numbers<[1], [0], [0], [1], [0, 0, 1, 1], [], []>} : vector<8x48xf32>, vector<48x48xf32>, vector<8x48xf32> -> vector<8x48xf32>
    %14 = vector.extract_strided_slice %13 {offsets = [0, 32], sizes = [8, 16], strides = [1, 1]} : vector<8x48xf32> to vector<8x16xf32>
    %15 = vector.broadcast %6 : vector<1x16xf32> to vector<8x16xf32>
    %16 = arith.addf %14, %15 : vector<8x16xf32>
    %17 = vector.extract_strided_slice %13 {offsets = [0, 0], sizes = [8, 32], strides = [1, 1]} : vector<8x48xf32> to vector<8x32xf32>
    %18 = vector.broadcast %4 : vector<1x32xf32> to vector<8x32xf32>
    %19 = arith.addf %17, %18 : vector<8x32xf32>
    %cst_8 = arith.constant 0.000000e+00 : f32
    %20 = vector.broadcast %cst_8 : f32 to vector<8x32xf32>
    %21 = arith.maximumf %19, %20 : vector<8x32xf32>
    %cst_9 = arith.constant dense<0xFF800000> : vector<8xf32>
    %22 = vector.multi_reduction <maximumf>, %16, %cst_9 [1] : vector<8x16xf32> to vector<8xf32>
    %23 = vector.shape_cast %22 : vector<8xf32> to vector<8x1xf32>
    %24 = vector.broadcast %23 : vector<8x1xf32> to vector<8x16xf32>
    %25 = arith.subf %16, %24 : vector<8x16xf32>
    %26 = math.exp %25 : vector<8x16xf32>
    %cst_10 = arith.constant dense<0.000000e+00> : vector<8xf32>
    %27 = vector.multi_reduction <add>, %26, %cst_10 [1] : vector<8x16xf32> to vector<8xf32>
    %28 = vector.shape_cast %27 : vector<8xf32> to vector<8x1xf32>
    %29 = vector.broadcast %28 : vector<8x1xf32> to vector<8x16xf32>
    %30 = arith.divf %26, %29 : vector<8x16xf32>
    %31 = tpu.concatenate %16, %16 in 1 : vector<8x16xf32>, vector<8x16xf32> -> vector<8x32xf32>
    %cst_11 = arith.constant 1.000000e+00 : f32
    %32 = vector.broadcast %cst_11 : f32 to vector<8x16xf32>
    %33 = vector.extract_strided_slice %31 {offsets = [0, 1], sizes = [8, 16], strides = [1, 1]} : vector<8x32xf32> to vector<8x16xf32>
    %34 = arith.cmpf oge, %33, %16 : vector<8x16xf32>
    %cst_12 = arith.constant 1.000000e+00 : f32
    %cst_13 = arith.constant 0.000000e+00 : f32
    %35 = vector.broadcast %cst_12 : f32 to vector<8x16xf32>
    %36 = vector.broadcast %cst_13 : f32 to vector<8x16xf32>
    %37 = arith.select %34, %35, %36 : vector<8x16xi1>, vector<8x16xf32>
    %38 = arith.addf %32, %37 : vector<8x16xf32>
    %cst_14 = arith.constant 0.000000e+00 : f32
    %39 = vector.broadcast %cst_14 : f32 to vector<8x16xf32>
    %40 = arith.select %34, %33, %39 : vector<8x16xi1>, vector<8x16xf32>
    %41 = arith.addf %16, %40 : vector<8x16xf32>
    %42 = vector.extract_strided_slice %31 {offsets = [0, 2], sizes = [8, 16], strides = [1, 1]} : vector<8x32xf32> to vector<8x16xf32>
    %43 = arith.cmpf oge, %42, %16 : vector<8x16xf32>
    %cst_15 = arith.constant 1.000000e+00 : f32
    %cst_16 = arith.constant 0.000000e+00 : f32
    %44 = vector.broadcast %cst_15 : f32 to vector<8x16xf32>
    %45 = vector.broadcast %cst_16 : f32 to vector<8x16xf32>
    %46 = arith.select %43, %44, %45 : vector<8x16xi1>, vector<8x16xf32>
    %47 = arith.addf %38, %46 : vector<8x16xf32>
    %cst_17 = arith.constant 0.000000e+00 : f32
    %48 = vector.broadcast %cst_17 : f32 to vector<8x16xf32>
    %49 = arith.select %43, %42, %48 : vector<8x16xi1>, vector<8x16xf32>
    %50 = arith.addf %41, %49 : vector<8x16xf32>
    %51 = vector.extract_strided_slice %31 {offsets = [0, 3], sizes = [8, 16], strides = [1, 1]} : vector<8x32xf32> to vector<8x16xf32>
    %52 = arith.cmpf oge, %51, %16 : vector<8x16xf32>
    %cst_18 = arith.constant 1.000000e+00 : f32
    %cst_19 = arith.constant 0.000000e+00 : f32
    %53 = vector.broadcast %cst_18 : f32 to vector<8x16xf32>
    %54 = vector.broadcast %cst_19 : f32 to vector<8x16xf32>
    %55 = arith.select %52, %53, %54 : vector<8x16xi1>, vector<8x16xf32>
    %56 = arith.addf %47, %55 : vector<8x16xf32>
    %cst_20 = arith.constant 0.000000e+00 : f32
    %57 = vector.broadcast %cst_20 : f32 to vector<8x16xf32>
    %58 = arith.select %52, %51, %57 : vector<8x16xi1>, vector<8x16xf32>
    %59 = arith.addf %50, %58 : vector<8x16xf32>
    %60 = vector.extract_strided_slice %31 {offsets = [0, 4], sizes = [8, 16], strides = [1, 1]} : vector<8x32xf32> to vector<8x16xf32>
    %61 = arith.cmpf oge, %60, %16 : vector<8x16xf32>
    %cst_21 = arith.constant 1.000000e+00 : f32
    %cst_22 = arith.constant 0.000000e+00 : f32
    %62 = vector.broadcast %cst_21 : f32 to vector<8x16xf32>
    %63 = vector.broadcast %cst_22 : f32 to vector<8x16xf32>
    %64 = arith.select %61, %62, %63 : vector<8x16xi1>, vector<8x16xf32>
    %65 = arith.addf %56, %64 : vector<8x16xf32>
    %cst_23 = arith.constant 0.000000e+00 : f32
    %66 = vector.broadcast %cst_23 : f32 to vector<8x16xf32>
    %67 = arith.select %61, %60, %66 : vector<8x16xi1>, vector<8x16xf32>
    %68 = arith.addf %59, %67 : vector<8x16xf32>
    %69 = vector.extract_strided_slice %31 {offsets = [0, 5], sizes = [8, 16], strides = [1, 1]} : vector<8x32xf32> to vector<8x16xf32>
    %70 = arith.cmpf oge, %69, %16 : vector<8x16xf32>
    %cst_24 = arith.constant 1.000000e+00 : f32
    %cst_25 = arith.constant 0.000000e+00 : f32
    %71 = vector.broadcast %cst_24 : f32 to vector<8x16xf32>
    %72 = vector.broadcast %cst_25 : f32 to vector<8x16xf32>
    %73 = arith.select %70, %71, %72 : vector<8x16xi1>, vector<8x16xf32>
    %74 = arith.addf %65, %73 : vector<8x16xf32>
    %cst_26 = arith.constant 0.000000e+00 : f32
    %75 = vector.broadcast %cst_26 : f32 to vector<8x16xf32>
    %76 = arith.select %70, %69, %75 : vector<8x16xi1>, vector<8x16xf32>
    %77 = arith.addf %68, %76 : vector<8x16xf32>
    %78 = vector.extract_strided_slice %31 {offsets = [0, 6], sizes = [8, 16], strides = [1, 1]} : vector<8x32xf32> to vector<8x16xf32>
    %79 = arith.cmpf oge, %78, %16 : vector<8x16xf32>
    %cst_27 = arith.constant 1.000000e+00 : f32
    %cst_28 = arith.constant 0.000000e+00 : f32
    %80 = vector.broadcast %cst_27 : f32 to vector<8x16xf32>
    %81 = vector.broadcast %cst_28 : f32 to vector<8x16xf32>
    %82 = arith.select %79, %80, %81 : vector<8x16xi1>, vector<8x16xf32>
    %83 = arith.addf %74, %82 : vector<8x16xf32>
    %cst_29 = arith.constant 0.000000e+00 : f32
    %84 = vector.broadcast %cst_29 : f32 to vector<8x16xf32>
    %85 = arith.select %79, %78, %84 : vector<8x16xi1>, vector<8x16xf32>
    %86 = arith.addf %77, %85 : vector<8x16xf32>
    %87 = vector.extract_strided_slice %31 {offsets = [0, 7], sizes = [8, 16], strides = [1, 1]} : vector<8x32xf32> to vector<8x16xf32>
    %88 = arith.cmpf oge, %87, %16 : vector<8x16xf32>
    %cst_30 = arith.constant 1.000000e+00 : f32
    %cst_31 = arith.constant 0.000000e+00 : f32
    %89 = vector.broadcast %cst_30 : f32 to vector<8x16xf32>
    %90 = vector.broadcast %cst_31 : f32 to vector<8x16xf32>
    %91 = arith.select %88, %89, %90 : vector<8x16xi1>, vector<8x16xf32>
    %92 = arith.addf %83, %91 : vector<8x16xf32>
    %cst_32 = arith.constant 0.000000e+00 : f32
    %93 = vector.broadcast %cst_32 : f32 to vector<8x16xf32>
    %94 = arith.select %88, %87, %93 : vector<8x16xi1>, vector<8x16xf32>
    %95 = arith.addf %86, %94 : vector<8x16xf32>
    %96 = vector.extract_strided_slice %31 {offsets = [0, 8], sizes = [8, 16], strides = [1, 1]} : vector<8x32xf32> to vector<8x16xf32>
    %97 = arith.cmpf oge, %96, %16 : vector<8x16xf32>
    %cst_33 = arith.constant 1.000000e+00 : f32
    %cst_34 = arith.constant 0.000000e+00 : f32
    %98 = vector.broadcast %cst_33 : f32 to vector<8x16xf32>
    %99 = vector.broadcast %cst_34 : f32 to vector<8x16xf32>
    %100 = arith.select %97, %98, %99 : vector<8x16xi1>, vector<8x16xf32>
    %101 = arith.addf %92, %100 : vector<8x16xf32>
    %cst_35 = arith.constant 0.000000e+00 : f32
    %102 = vector.broadcast %cst_35 : f32 to vector<8x16xf32>
    %103 = arith.select %97, %96, %102 : vector<8x16xi1>, vector<8x16xf32>
    %104 = arith.addf %95, %103 : vector<8x16xf32>
    %105 = vector.extract_strided_slice %31 {offsets = [0, 9], sizes = [8, 16], strides = [1, 1]} : vector<8x32xf32> to vector<8x16xf32>
    %106 = arith.cmpf oge, %105, %16 : vector<8x16xf32>
    %cst_36 = arith.constant 1.000000e+00 : f32
    %cst_37 = arith.constant 0.000000e+00 : f32
    %107 = vector.broadcast %cst_36 : f32 to vector<8x16xf32>
    %108 = vector.broadcast %cst_37 : f32 to vector<8x16xf32>
    %109 = arith.select %106, %107, %108 : vector<8x16xi1>, vector<8x16xf32>
    %110 = arith.addf %101, %109 : vector<8x16xf32>
    %cst_38 = arith.constant 0.000000e+00 : f32
    %111 = vector.broadcast %cst_38 : f32 to vector<8x16xf32>
    %112 = arith.select %106, %105, %111 : vector<8x16xi1>, vector<8x16xf32>
    %113 = arith.addf %104, %112 : vector<8x16xf32>
    %114 = vector.extract_strided_slice %31 {offsets = [0, 10], sizes = [8, 16], strides = [1, 1]} : vector<8x32xf32> to vector<8x16xf32>
    %115 = arith.cmpf oge, %114, %16 : vector<8x16xf32>
    %cst_39 = arith.constant 1.000000e+00 : f32
    %cst_40 = arith.constant 0.000000e+00 : f32
    %116 = vector.broadcast %cst_39 : f32 to vector<8x16xf32>
    %117 = vector.broadcast %cst_40 : f32 to vector<8x16xf32>
    %118 = arith.select %115, %116, %117 : vector<8x16xi1>, vector<8x16xf32>
    %119 = arith.addf %110, %118 : vector<8x16xf32>
    %cst_41 = arith.constant 0.000000e+00 : f32
    %120 = vector.broadcast %cst_41 : f32 to vector<8x16xf32>
    %121 = arith.select %115, %114, %120 : vector<8x16xi1>, vector<8x16xf32>
    %122 = arith.addf %113, %121 : vector<8x16xf32>
    %123 = vector.extract_strided_slice %31 {offsets = [0, 11], sizes = [8, 16], strides = [1, 1]} : vector<8x32xf32> to vector<8x16xf32>
    %124 = arith.cmpf oge, %123, %16 : vector<8x16xf32>
    %cst_42 = arith.constant 1.000000e+00 : f32
    %cst_43 = arith.constant 0.000000e+00 : f32
    %125 = vector.broadcast %cst_42 : f32 to vector<8x16xf32>
    %126 = vector.broadcast %cst_43 : f32 to vector<8x16xf32>
    %127 = arith.select %124, %125, %126 : vector<8x16xi1>, vector<8x16xf32>
    %128 = arith.addf %119, %127 : vector<8x16xf32>
    %cst_44 = arith.constant 0.000000e+00 : f32
    %129 = vector.broadcast %cst_44 : f32 to vector<8x16xf32>
    %130 = arith.select %124, %123, %129 : vector<8x16xi1>, vector<8x16xf32>
    %131 = arith.addf %122, %130 : vector<8x16xf32>
    %132 = vector.extract_strided_slice %31 {offsets = [0, 12], sizes = [8, 16], strides = [1, 1]} : vector<8x32xf32> to vector<8x16xf32>
    %133 = arith.cmpf oge, %132, %16 : vector<8x16xf32>
    %cst_45 = arith.constant 1.000000e+00 : f32
    %cst_46 = arith.constant 0.000000e+00 : f32
    %134 = vector.broadcast %cst_45 : f32 to vector<8x16xf32>
    %135 = vector.broadcast %cst_46 : f32 to vector<8x16xf32>
    %136 = arith.select %133, %134, %135 : vector<8x16xi1>, vector<8x16xf32>
    %137 = arith.addf %128, %136 : vector<8x16xf32>
    %cst_47 = arith.constant 0.000000e+00 : f32
    %138 = vector.broadcast %cst_47 : f32 to vector<8x16xf32>
    %139 = arith.select %133, %132, %138 : vector<8x16xi1>, vector<8x16xf32>
    %140 = arith.addf %131, %139 : vector<8x16xf32>
    %141 = vector.extract_strided_slice %31 {offsets = [0, 13], sizes = [8, 16], strides = [1, 1]} : vector<8x32xf32> to vector<8x16xf32>
    %142 = arith.cmpf oge, %141, %16 : vector<8x16xf32>
    %cst_48 = arith.constant 1.000000e+00 : f32
    %cst_49 = arith.constant 0.000000e+00 : f32
    %143 = vector.broadcast %cst_48 : f32 to vector<8x16xf32>
    %144 = vector.broadcast %cst_49 : f32 to vector<8x16xf32>
    %145 = arith.select %142, %143, %144 : vector<8x16xi1>, vector<8x16xf32>
    %146 = arith.addf %137, %145 : vector<8x16xf32>
    %cst_50 = arith.constant 0.000000e+00 : f32
    %147 = vector.broadcast %cst_50 : f32 to vector<8x16xf32>
    %148 = arith.select %142, %141, %147 : vector<8x16xi1>, vector<8x16xf32>
    %149 = arith.addf %140, %148 : vector<8x16xf32>
    %150 = vector.extract_strided_slice %31 {offsets = [0, 14], sizes = [8, 16], strides = [1, 1]} : vector<8x32xf32> to vector<8x16xf32>
    %151 = arith.cmpf oge, %150, %16 : vector<8x16xf32>
    %cst_51 = arith.constant 1.000000e+00 : f32
    %cst_52 = arith.constant 0.000000e+00 : f32
    %152 = vector.broadcast %cst_51 : f32 to vector<8x16xf32>
    %153 = vector.broadcast %cst_52 : f32 to vector<8x16xf32>
    %154 = arith.select %151, %152, %153 : vector<8x16xi1>, vector<8x16xf32>
    %155 = arith.addf %146, %154 : vector<8x16xf32>
    %cst_53 = arith.constant 0.000000e+00 : f32
    %156 = vector.broadcast %cst_53 : f32 to vector<8x16xf32>
    %157 = arith.select %151, %150, %156 : vector<8x16xi1>, vector<8x16xf32>
    %158 = arith.addf %149, %157 : vector<8x16xf32>
    %159 = vector.extract_strided_slice %31 {offsets = [0, 15], sizes = [8, 16], strides = [1, 1]} : vector<8x32xf32> to vector<8x16xf32>
    %160 = arith.cmpf oge, %159, %16 : vector<8x16xf32>
    %cst_54 = arith.constant 1.000000e+00 : f32
    %cst_55 = arith.constant 0.000000e+00 : f32
    %161 = vector.broadcast %cst_54 : f32 to vector<8x16xf32>
    %162 = vector.broadcast %cst_55 : f32 to vector<8x16xf32>
    %163 = arith.select %160, %161, %162 : vector<8x16xi1>, vector<8x16xf32>
    %164 = arith.addf %155, %163 : vector<8x16xf32>
    %cst_56 = arith.constant 0.000000e+00 : f32
    %165 = vector.broadcast %cst_56 : f32 to vector<8x16xf32>
    %166 = arith.select %160, %159, %165 : vector<8x16xi1>, vector<8x16xf32>
    %167 = arith.addf %158, %166 : vector<8x16xf32>
    %168 = arith.mulf %164, %16 : vector<8x16xf32>
    %cst_57 = arith.constant 1.000000e+00 : f32
    %169 = vector.broadcast %cst_57 : f32 to vector<8x16xf32>
    %170 = arith.addf %169, %168 : vector<8x16xf32>
    %171 = arith.cmpf ogt, %170, %167 : vector<8x16xf32>
    %cst_58 = arith.constant 1.000000e+00 : f32
    %cst_59 = arith.constant 0.000000e+00 : f32
    %172 = vector.broadcast %cst_58 : f32 to vector<8x16xf32>
    %173 = vector.broadcast %cst_59 : f32 to vector<8x16xf32>
    %174 = arith.select %171, %172, %173 : vector<8x16xi1>, vector<8x16xf32>
    %cst_60 = arith.constant dense<0.000000e+00> : vector<8xf32>
    %175 = vector.multi_reduction <add>, %174, %cst_60 [1] : vector<8x16xf32> to vector<8xf32>
    %176 = vector.shape_cast %175 : vector<8xf32> to vector<8x1xf32>
    %177 = arith.mulf %16, %174 : vector<8x16xf32>
    %cst_61 = arith.constant dense<0.000000e+00> : vector<8xf32>
    %178 = vector.multi_reduction <add>, %177, %cst_61 [1] : vector<8x16xf32> to vector<8xf32>
    %179 = vector.shape_cast %178 : vector<8xf32> to vector<8x1xf32>
    %cst_62 = arith.constant 1.000000e+00 : f32
    %180 = vector.broadcast %cst_62 : f32 to vector<8x1xf32>
    %181 = arith.subf %179, %180 : vector<8x1xf32>
    %182 = arith.divf %181, %176 : vector<8x1xf32>
    %183 = vector.broadcast %182 : vector<8x1xf32> to vector<8x16xf32>
    %184 = arith.subf %16, %183 : vector<8x16xf32>
    %cst_63 = arith.constant 0.000000e+00 : f32
    %185 = vector.broadcast %cst_63 : f32 to vector<8x16xf32>
    %186 = arith.maximumf %184, %185 : vector<8x16xf32>
    %cst_64 = arith.constant dense<0.000000e+00> : vector<8x16xf32>
    %187 = tpu.matmul %21, %10, %cst_64 {dimension_numbers = #tpu.dot_dimension_numbers<[1], [0], [0], [1], [0, 0, 1, 1], [], []>} : vector<8x32xf32>, vector<32x16xf32>, vector<8x16xf32> -> vector<8x16xf32>
    %188 = vector.broadcast %5 : vector<1x16xf32> to vector<8x16xf32>
    %189 = arith.addf %187, %188 : vector<8x16xf32>
    %cst_65 = arith.constant dense<0xFF800000> : vector<8xf32>
    %190 = vector.multi_reduction <maximumf>, %189, %cst_65 [1] : vector<8x16xf32> to vector<8xf32>
    %191 = vector.shape_cast %190 : vector<8xf32> to vector<8x1xf32>
    %192 = vector.broadcast %191 : vector<8x1xf32> to vector<8x16xf32>
    %193 = arith.subf %189, %192 : vector<8x16xf32>
    %194 = math.exp %193 : vector<8x16xf32>
    %cst_66 = arith.constant dense<0.000000e+00> : vector<8xf32>
    %195 = vector.multi_reduction <add>, %194, %cst_66 [1] : vector<8x16xf32> to vector<8xf32>
    %196 = vector.shape_cast %195 : vector<8xf32> to vector<8x1xf32>
    %197 = vector.broadcast %196 : vector<8x1xf32> to vector<8x16xf32>
    %198 = arith.divf %194, %197 : vector<8x16xf32>
    %199 = arith.addf %189, %2 : vector<8x16xf32>
    %cst_67 = arith.constant 1.49253726 : f32
    %200 = vector.broadcast %cst_67 : f32 to vector<8x16xf32>
    %201 = arith.mulf %199, %200 : vector<8x16xf32>
    %cst_68 = arith.constant dense<0xFF800000> : vector<8xf32>
    %202 = vector.multi_reduction <maximumf>, %201, %cst_68 [1] : vector<8x16xf32> to vector<8xf32>
    %203 = vector.shape_cast %202 : vector<8xf32> to vector<8x1xf32>
    %204 = vector.broadcast %203 : vector<8x1xf32> to vector<8x16xf32>
    %205 = arith.subf %201, %204 : vector<8x16xf32>
    %206 = math.exp %205 : vector<8x16xf32>
    %cst_69 = arith.constant dense<0.000000e+00> : vector<8xf32>
    %207 = vector.multi_reduction <add>, %206, %cst_69 [1] : vector<8x16xf32> to vector<8xf32>
    %208 = vector.shape_cast %207 : vector<8xf32> to vector<8x1xf32>
    %209 = vector.broadcast %208 : vector<8x1xf32> to vector<8x16xf32>
    %210 = arith.divf %206, %209 : vector<8x16xf32>
    %cst_70 = arith.constant dense<0.000000e+00> : vector<8x32xf32>
    %211 = tpu.matmul %210, %11, %cst_70 {dimension_numbers = #tpu.dot_dimension_numbers<[1], [0], [0], [1], [0, 0, 1, 1], [], []>} : vector<8x16xf32>, vector<16x32xf32>, vector<8x32xf32> -> vector<8x32xf32>
    %212 = vector.broadcast %7 : vector<1x32xf32> to vector<8x32xf32>
    %213 = arith.addf %211, %212 : vector<8x32xf32>
    %cst_71 = arith.constant 0.000000e+00 : f32
    %214 = vector.broadcast %cst_71 : f32 to vector<8x32xf32>
    %215 = arith.maximumf %213, %214 : vector<8x32xf32>
    %cst_72 = arith.constant dense<0.000000e+00> : vector<8x32xf32>
    %216 = tpu.matmul %215, %12, %cst_72 {dimension_numbers = #tpu.dot_dimension_numbers<[1], [0], [0], [1], [0, 0, 1, 1], [], []>} : vector<8x32xf32>, vector<32x32xf32>, vector<8x32xf32> -> vector<8x32xf32>
    %217 = vector.broadcast %8 : vector<1x32xf32> to vector<8x32xf32>
    %218 = arith.addf %216, %217 : vector<8x32xf32>
    %cst_73 = arith.constant 5.000000e-01 : f32
    %219 = vector.broadcast %cst_73 : f32 to vector<8x32xf32>
    %220 = arith.mulf %219, %218 : vector<8x32xf32>
    %221 = math.tanh %220 : vector<8x32xf32>
    %cst_74 = arith.constant 1.000000e+00 : f32
    %222 = vector.broadcast %cst_74 : f32 to vector<8x32xf32>
    %223 = arith.addf %222, %221 : vector<8x32xf32>
    %cst_75 = arith.constant 5.000000e-01 : f32
    %224 = vector.broadcast %cst_75 : f32 to vector<8x32xf32>
    %225 = arith.mulf %224, %223 : vector<8x32xf32>
    %c0_76 = arith.constant 0 : index
    %c0_77 = arith.constant 0 : index
    %226 = vector.load %arg3[%c0_76, %c0_77] : memref<8x128xf32, #tpu.memory_space<vmem>>, vector<8x32xf32>
    tpu.vector_store %arg3[%c0_76, %c0_77], %225 {strides = array<i32>} : memref<8x128xf32, #tpu.memory_space<vmem>>, vector<8x32xf32>,
    %c0_78 = arith.constant 0 : index
    %c32 = arith.constant 32 : index
    %227 = vector.load %arg3[%c0_78, %c32] : memref<8x128xf32, #tpu.memory_space<vmem>>, vector<8x16xf32>
    tpu.vector_store %arg3[%c0_78, %c32], %198 {strides = array<i32>} : memref<8x128xf32, #tpu.memory_space<vmem>>, vector<8x16xf32>,
    %c0_79 = arith.constant 0 : index
    %c48_80 = arith.constant 48 : index
    %228 = vector.load %arg3[%c0_79, %c48_80] : memref<8x128xf32, #tpu.memory_space<vmem>>, vector<8x16xf32>
    tpu.vector_store %arg3[%c0_79, %c48_80], %30 {strides = array<i32>} : memref<8x128xf32, #tpu.memory_space<vmem>>, vector<8x16xf32>,
    %c0_81 = arith.constant 0 : index
    %c64 = arith.constant 64 : index
    %229 = vector.load %arg3[%c0_81, %c64] : memref<8x128xf32, #tpu.memory_space<vmem>>, vector<8x16xf32>
    tpu.vector_store %arg3[%c0_81, %c64], %186 {strides = array<i32>} : memref<8x128xf32, #tpu.memory_space<vmem>>, vector<8x16xf32>,
    %c0_82 = arith.constant 0 : index
    %c80_83 = arith.constant 80 : index
    %230 = vector.load %arg3[%c0_82, %c80_83] : memref<8x128xf32, #tpu.memory_space<vmem>>, vector<8x16xf32>
    tpu.vector_store %arg3[%c0_82, %c80_83], %210 {strides = array<i32>} : memref<8x128xf32, #tpu.memory_space<vmem>>, vector<8x16xf32>,
    %cst_84 = arith.constant 0.000000e+00 : f32
    %231 = vector.broadcast %cst_84 : f32 to vector<8x32xf32>
    %c0_85 = arith.constant 0 : index
    %c96_86 = arith.constant 96 : index
    %232 = vector.load %arg3[%c0_85, %c96_86] : memref<8x128xf32, #tpu.memory_space<vmem>>, vector<8x32xf32>
    tpu.vector_store %arg3[%c0_85, %c96_86], %231 {strides = array<i32>} : memref<8x128xf32, #tpu.memory_space<vmem>>, vector<8x32xf32>,
    return
  }
}

</mosaic_0001>

<bundles_post_ra>
// kernel: vae_forward_packed.1
= control target key start
LH: loop header
LB: loop body
LE: loop exit
PB: predicated region body
PF: predicated region fallthrough
CT: control target
= control target key end

     0   :  { %v863_v0 = vmov 0.0|0.0   ;;  %vm864_vm0 = vmmov 0   ;;  %v865_v4 = vmov 0.0   ;;  %s866_s24 = smov 96   ;;  %s867_s5 = smov 80   ;;  %vm32_vm1 = vcmask 392192   ;;  %s1248_s1 = inlined_call_operand.vmem [shape: f32[128,48], index: 1, kind: input, shape index: {}]   ;;  %s1249_s2 = inlined_call_operand.vmem [shape: f32[1,128], index: 2, kind: input, shape index: {}]   ;;  %s1250_s0 = inlined_call_operand.vmem [shape: f32[8,64], index: 0, kind: input, shape index: {}]   ;;  %s1251_s3 = inlined_call_operand.vmem [shape: f32[8,128], index: 3, kind: output, shape index: {}]  }
   0x1   :  { %770 = vmatprep.subr.bf16.mxu0 %v863_v0  ;;  %v16_v1 = vld [vmem:[%s1248_s1] sm:$0xff]  ;;  %v17_v2 = vld [vmem:[%s1248_s1 + $0x8] sm:$0xff]  ;;  %v18_v3 = vld [vmem:[%s1248_s1 + $0x10] sm:$0xff]  ;;  %738 = vmatprep.mubr.msk.f32.mxu0 %vm864_vm0, %v865_v4  ;;  %s868_s6 = smov 112   ;;  %vm413_vm2 = vcmask 261120   ;;  %s869_s10 = smov 97  }
   0x2   :  { %v771_v5 = vpack.c.bf16 %v17_v2, %v16_v1  ;;  %v19_v6 = vld [vmem:[%s1248_s1 + $0x18] sm:$0xff]  ;;  %779 = vmatprep.subr.bf16.mxu1 %v863_v0  ;;  %749 = vmatprep.mubr.msk.f32.mxu1 %vm864_vm0, %v865_v4  ;;  %v957_v7 = vld [vmem:[%s1249_s2] ss:$0 sm:$0xff]  ;;  %v22_v8 = vld [vmem:[%s1248_s1 + $0x30] sm:$0xff]  ;;  %s870_s11 = smov 98   ;;  %s871_s12 = smov 99  }
   0x3   :  { %v774_v9 = vpack.c.bf16 %v19_v6, %v18_v3  ;;  %410 = vrot.lane.b32.xlu0 %v957_v7, %s866_s24  ;;  %v23_v10 = vld [vmem:[%s1248_s1 + $0x38] sm:$0xff]  ;;  %v20_v11 = vld [vmem:[%s1248_s1 + $0x20] sm:$0xff]  ;;  %v21_v12 = vld [vmem:[%s1248_s1 + $0x28] sm:$0xff]  ;;  %s872_s13 = smov 101   ;;  %s873_s14 = smov 103   ;;  %vm1252_vm3 = vcmask 130048  }
   0x4   :  { %772 = vmatpush3.bf16.msra.mxu0 %v771_v5  ;;  %v780_v13 = vpack.c.bf16 %v23_v10, %v22_v8  ;;  %v14_v14 = vld [vmem:[%s1250_s0] sm:$0xff]  ;;  %v777_v15 = vpack.c.bf16 %v21_v12, %v20_v11  ;;  %v25_v17 = vld [vmem:[%s1248_s1 + $0x48] sm:$0xff]  ;;  %s874_s15 = smov 105   ;;  %s875_s16 = smov 107   ;;  %v26_v38 = vld [vmem:[%s1248_s1 + $0x50] sm:$0xff] }
   0x5   :  { %773 = vmatprep.subr.bf16.mxu0 %v863_v0  ;;  %v24_v16 = vld [vmem:[%s1248_s1 + $0x40] sm:$0xff]  ;;  %s876_s17 = smov 109   ;;  %s877_s18 = smov 111   ;;  %v27_v39 = vld [vmem:[%s1248_s1 + $0x58] sm:$0xff] }
   0x6   :  { %781 = vmatpush3.bf16.msra.mxu1 %v780_v13  ;;  %v783_v18 = vpack.c.bf16 %v25_v17, %v24_v16  ;;  %s878_s19 = smov 100   ;;  %v786_v40 = vpack.c.bf16 %v27_v39, %v26_v38  ;;  %s879_s25 = smov 102  }
   0x7   :  { %498 = vrot.lane.b32.xlu0 %v14_v14, %s867_s5  ;;  %782 = vmatprep.subr.bf16.mxu1 %v863_v0  ;;  %s880_s26 = smov 104   ;;  %s881_s27 = smov 106  }
   0x8   :  { %775 = vmatpush3.bf16.msra.mxu0 %v774_v9  ;;  %s882_s28 = smov 108   ;;  %s883_s2 = smov 110  }
   0x9   :  { %776 = vmatprep.subr.bf16.mxu0 %v863_v0  ;;  %s884_s29 = smov 30   ;;  %s885_s30 = smov 31  }
   0xa   :  { %784 = vmatpush3.bf16.msra.mxu1 %v783_v18  ;;  %s886_s4 = smov 29   ;;  %s888_s0 = smov 27  }
   0xb   :  { %111 = vrot.lane.b32.xlu0 %v957_v7, %s868_s6  ;;  %785 = vmatprep.subr.bf16.mxu1 %v863_v0  ;;  %s889_s7 = smov 26   ;;  %s890_s8 = smov 25  }
   0xc   :  { %778 = vmatpush3.bf16.msra.mxu0 %v777_v15  ;;  %s891_s9 = smov 24   ;;  %s901_s20 = smov 125  }
   0xd   :  { %788 = vmatprep.subr.bf16.mxu0 %v863_v0  ;;  %s902_s21 = smov 124   ;;  %s903_s22 = smov 123  }
   0xe   :  { %s904_s23 = smov 122  }
   0xf   :  { %739 = vmatmul.mubr.msk.f32.vlgmr.msra.gmra.mrb[0].mxu0 %vm32_vm1, %v14_v14 }
  0x10   :  { %767 = vmatprep.mubr.msk.f32.mxu0 %vm864_vm0, %v865_v4 }
  0x75   :  { %v411_v19 = vpop.permute.xlu0 %410 }
  0x79   :  { %v499_v20 = vpop.permute.xlu0 %498 }
  0x7d   :  { %v112_v21 = vpop.permute.xlu0 %111 }
  0xe2   :  { %v102_v22 = vpop.f32.mrb[0].mxu0 }
  0xe3   :  { %v991_v23 = vadd.f32 %v112_v21, %v102_v22  ;;  %v116_v24 = vadd.f32 %v957_v7, %v102_v22  ;;  %v740_v25 = vpop.f32.mrb[1].mxu0 }
  0xe5   :  { %v117_v26 = vmax.f32 %v116_v24, 0.0  ;;  %139 = vrot.lane.b32.xlu0 %v991_v23, %s868_s6  ;;  %s887_s6 = smov 28  }
  0xe7   :  { %750 = vmatmul.mubr.msk.f32.vlgmr.msra.gmra.mrb[0].mxu1 %vm413_vm2, %v117_v26 }
  0xe8   :  { %756 = vmatprep.mubr.msk.f32.mxu1 %vm864_vm0, %v865_v4  ;;  %787 = vmatpush3.bf16.msra.mxu1 %v786_v40 }
  0xe9   :  { %143 = vrot.lane.b32.xlu0 %v991_v23, %s869_s10 }
  0xed   :  { %155 = vrot.lane.b32.xlu0 %v991_v23, %s870_s11  ;;  %s892_s11 = smov 23  }
  0xf1   :  { %171 = vrot.lane.b32.xlu0 %v991_v23, %s871_s12  ;;  %s893_s12 = smov 22  }
  0xf5   :  { %203 = vrot.lane.b32.xlu0 %v991_v23, %s872_s13  ;;  %s894_s13 = smov 21  }
  0xf9   :  { %235 = vrot.lane.b32.xlu0 %v991_v23, %s873_s14  ;;  %s895_s14 = smov 20  }
  0xfd   :  { %267 = vrot.lane.b32.xlu0 %v991_v23, %s874_s15  ;;  %s896_s15 = smov 19  }
 0x101   :  { %299 = vrot.lane.b32.xlu0 %v991_v23, %s875_s16  ;;  %s897_s16 = smov 18  }
 0x105   :  { %331 = vrot.lane.b32.xlu0 %v991_v23, %s876_s17  ;;  %s898_s17 = smov 17  }
 0x109   :  { %363 = vrot.lane.b32.xlu0 %v991_v23, %s877_s18  ;;  %s899_s18 = smov 127  }
 0x157   :  { %v140_v41 = vpop.permute.xlu0 %139 }
 0x15b   :  { %v1027_v42 = vpop.permute.xlu0 %143 }
 0x15f   :  { %v1029_v43 = vpop.permute.xlu0 %155 }
 0x163   :  { %v1031_v44 = vpop.permute.xlu0 %171 }
 0x167   :  { %v1033_v46 = vpop.permute.xlu0 %203 }
 0x16b   :  { %v1042_v49 = vpop.permute.xlu0 %235 }
 0x16f   :  { %v1073_v58 = vpop.permute.xlu0 %267 }
 0x173   :  { %v1093_v63 = vpop.permute.xlu0 %299 }
 0x177   :  { %v332_v8 = vpop.permute.xlu0 %331 }
 0x17b   :  { %v364_v13 = vpop.permute.xlu0 %363 }
 0x1ba   :  { %v483_v27 = vpop.f32.mrb[0].mxu1 }
 0x1bb   :  { %v1008_v28 = vadd.f32 %v483_v27, %v411_v19  ;;  %v751_v29 = vpop.f32.mrb[1].mxu1 }
 0x1bc   :  { %v28_v29 = vld [vmem:[%s1248_s1 + $0x60] sm:$0xff] }
 0x1bd   :  { %v501_v30 = vadd.f32 %v499_v20, %v1008_v28 }
 0x1bf   :  { %v502_v31 = vmul.f32 1.4925373, %v501_v30  ;;  %v29_v30 = vld [vmem:[%s1248_s1 + $0x68] sm:$0xff] }
 0x1c1   :  { %v503_v32 = vsel %vm1252_vm3, %v502_v31, -inf }
 0x1c2   :  { %504 = vmax.xlane.f32.xlu1 %v503_v32 }
 0x24f   :  { %v505_v33 = vpop.xlane.xlu1 %504 }
 0x250   :  { %v506_v34 = vsub.f32 %v502_v31, %v505_v33  ;;  %v789_v31 = vpack.c.bf16 %v29_v30, %v28_v29 }
 0x252   :  { %v507_v35 = vmul.f32 1.442695, %v506_v34  ;;  %790 = vmatpush3.bf16.msra.mxu0 %v789_v31 }
 0x253   :  { %791 = vmatprep.subr.bf16.mxu0 %v863_v0 }
 0x254   :  { %847 = vpow2.f32 %v507_v35  ;;  %v30_v35 = vld [vmem:[%s1248_s1 + $0x70] sm:$0xff] }
 0x25e   :  { %v848_v36 = vpop.eup %847 }
 0x25f   :  { %v509_v37 = vsel %vm1252_vm3, %v848_v36, 0.0 }
 0x260   :  { %510 = vadd.xlane.f32.xlu1 %v509_v37 }
 0x271   :  { %136 = vrot.lane.b32.xlu1 %v991_v23, %s866_s24 }
 0x275   :  { %187 = vrot.lane.b32.xlu1 %v991_v23, %s878_s19  ;;  %s900_s19 = smov 126  }
 0x279   :  { %219 = vrot.lane.b32.xlu1 %v991_v23, %s879_s25  ;;  %s905_s25 = smov 121  }
 0x27d   :  { %251 = vrot.lane.b32.xlu1 %v991_v23, %s880_s26  ;;  %s906_s26 = smov 120  }
 0x281   :  { %283 = vrot.lane.b32.xlu1 %v991_v23, %s881_s27  ;;  %s907_s27 = smov 119  }
 0x285   :  { %315 = vrot.lane.b32.xlu1 %v991_v23, %s882_s28  ;;  %s908_s28 = smov 118  }
 0x289   :  { %347 = vrot.lane.b32.xlu1 %v991_v23, %s883_s2  ;;  %s909_s2 = smov 117  }
 0x2ed   :  { %v511_v45 = vpop.xlane.xlu1 %510 }
 0x2ee   :  { %849 = vrcp.f32 %v511_v45 }
 0x2f1   :  { %v137_v47 = vpop.permute.xlu1 %136 }
 0x2f2   :  { %v1036_v48 = vsel %vm1252_vm3, %v137_v47, %v140_v41 }
 0x2f3   :  { %vm158_vm4 = vcmp.ge.f32.partialorder %v1036_v48, %v1029_v43  ;;  %vm146_vm5 = vcmp.ge.f32.partialorder %v1036_v48, %v1027_v42  ;;  %vm174_vm6 = vcmp.ge.f32.partialorder %v1036_v48, %v1031_v44  ;;  %vm206_vm8 = vcmp.ge.f32.partialorder %v1036_v48, %v1033_v46 }
 0x2f4   :  { %v165_v50 = vsel %vm158_vm4, %v1036_v48, 0.0  ;;  %v149_v51 = vsel %vm146_vm5, %v1036_v48, 0.0  ;;  %v181_v55 = vsel %vm174_vm6, %v1036_v48, 0.0  ;;  %v213_v60 = vsel %vm206_vm8, %v1036_v48, 0.0 }
 0x2f5   :  { %167 = vrot.lane.b32.xlu0 %v165_v50, %s884_s29  ;;  %151 = vrot.lane.b32.xlu1 %v149_v51, %s885_s30  ;;  %v1053_v52 = vpop.permute.xlu1 %187  ;;  %vm238_vm10 = vcmp.ge.f32.partialorder %v1036_v48, %v1042_v49  ;;  %vm270_vm12 = vcmp.ge.f32.partialorder %v1036_v48, %v1073_v58  ;;  %vm302_vm14 = vcmp.ge.f32.partialorder %v1036_v48, %v1093_v63  ;;  %v159_v16 = vsel %vm158_vm4, 1.0, %v865_v4 }
 0x2f6   :  { %vm190_vm7 = vcmp.ge.f32.partialorder %v1036_v48, %v1053_v52  ;;  %v245_v1 = vsel %vm238_vm10, %v1036_v48, 0.0  ;;  %v277_v5 = vsel %vm270_vm12, %v1036_v48, 0.0  ;;  %v309_v10 = vsel %vm302_vm14, %v1036_v48, 0.0 }
 0x2f7   :  { %v197_v53 = vsel %vm190_vm7, %v1036_v48, 0.0  ;;  %vm334_vm0 = vcmp.ge.f32.partialorder %v1036_v48, %v332_v8  ;;  %v191_v17 = vsel %vm190_vm7, 1.0, %v865_v4  ;;  %v175_v18 = vsel %vm174_vm6, 1.0, %v865_v4 }
 0x2f8   :  { %v850_v54 = vpop.eup %849  ;;  %v341_v14 = vsel %vm334_vm0, %v1036_v48, 0.0  ;;  %v207_v20 = vsel %vm206_vm8, 1.0, %v865_v4  ;;  %v239_v22 = vsel %vm238_vm10, 1.0, %v865_v4  ;;  %v271_v25 = vsel %vm270_vm12, 1.0, %v865_v4 }
 0x2f9   :  { %v1067_v56 = vmul.f32 %v850_v54, %v848_v36  ;;  %183 = vrot.lane.b32.xlu1 %v181_v55, %s886_s4  ;;  %199 = vrot.lane.b32.xlu0 %v197_v53, %s887_s6  ;;  %v1069_v57 = vpop.permute.xlu1 %219  ;;  %v303_v27 = vsel %vm302_vm14, 1.0, %v865_v4  ;;  %v335_v33 = vsel %vm334_vm0, 1.0, %v865_v4  ;;  %v31_v36 = vld [vmem:[%s1248_s1 + $0x78] sm:$0xff]  ;;  %s914_s1 = smov 32   ;;  %vm681_vm10 = vcmask 523648  }
 0x2fa   :  { %vm222_vm9 = vcmp.ge.f32.partialorder %v1036_v48, %v1069_v57  ;;  %v792_v37 = vpack.c.bf16 %v31_v36, %v30_v35  ;;  %vm694_vm12 = vcmask 1048320  }
 0x2fb   :  { %v229_v59 = vsel %vm222_vm9, %v1036_v48, 0.0  ;;  %757 = vmatmul.mubr.msk.f32.vlgmr.msra.gmra.mrb[2].mxu1 %vm1252_vm3, %v1067_v56  ;;  %vm366_vm3 = vcmp.ge.f32.partialorder %v1036_v48, %v364_v13  ;;  %v223_v19 = vsel %vm222_vm9, 1.0, %v865_v4 }
 0x2fc   :  { %v373_v15 = vsel %vm366_vm3, %v1036_v48, 0.0  ;;  %v367_v34 = vsel %vm366_vm3, 1.0, %v865_v4  ;;  %793 = vmatpush3.bf16.msra.mxu0 %v792_v37  ;;  %vm118_vm3 = vcmask 392448  }
 0x2fd   :  { %215 = vrot.lane.b32.xlu1 %v213_v60, %s888_s0  ;;  %231 = vrot.lane.b32.xlu0 %v229_v59, %s889_s7  ;;  %v252_v61 = vpop.permute.xlu1 %251  ;;  %s910_s7 = smov 116  }
 0x2fe   :  { %vm254_vm11 = vcmp.ge.f32.partialorder %v1036_v48, %v252_v61 }
 0x2ff   :  { %v261_v62 = vsel %vm254_vm11, %v1036_v48, 0.0  ;;  %v255_v21 = vsel %vm254_vm11, 1.0, %v865_v4  ;;  %vm692_vm11 = vcmask 786048  }
 0x301   :  { %247 = vrot.lane.b32.xlu1 %v245_v1, %s890_s8  ;;  %263 = vrot.lane.b32.xlu0 %v261_v62, %s891_s9  ;;  %v284_v2 = vpop.permute.xlu1 %283  ;;  %s911_s8 = smov 115   ;;  %s912_s9 = smov 114  }
 0x302   :  { %vm286_vm13 = vcmp.ge.f32.partialorder %v1036_v48, %v284_v2 }
 0x303   :  { %v293_v3 = vsel %vm286_vm13, %v1036_v48, 0.0  ;;  %v287_v24 = vsel %vm286_vm13, 1.0, %v865_v4 }
 0x305   :  { %279 = vrot.lane.b32.xlu1 %v277_v5, %s892_s11  ;;  %295 = vrot.lane.b32.xlu0 %v293_v3, %s893_s12  ;;  %v316_v6 = vpop.permute.xlu1 %315  ;;  %s913_s11 = smov 64  }
 0x306   :  { %vm318_vm15 = vcmp.ge.f32.partialorder %v1036_v48, %v316_v6 }
 0x307   :  { %v325_v9 = vsel %vm318_vm15, %v1036_v48, 0.0  ;;  %v319_v26 = vsel %vm318_vm15, 1.0, %v865_v4 }
 0x309   :  { %311 = vrot.lane.b32.xlu1 %v309_v10, %s894_s13  ;;  %327 = vrot.lane.b32.xlu0 %v325_v9, %s895_s14  ;;  %v348_v11 = vpop.permute.xlu1 %347  ;;  %v119_v10 = vsel %vm118_vm3, %v991_v23, -inf }
 0x30a   :  { %vm350_vm1 = vcmp.ge.f32.partialorder %v1036_v48, %v348_v11 }
 0x30b   :  { %v357_v12 = vsel %vm350_vm1, %v1036_v48, 0.0  ;;  %v351_v32 = vsel %vm350_vm1, 1.0, %v865_v4 }
 0x30d   :  { %343 = vrot.lane.b32.xlu1 %v341_v14, %s896_s15  ;;  %359 = vrot.lane.b32.xlu0 %v357_v12, %s897_s16  ;;  %v147_v14 = vsel %vm146_vm5, 1.0, %v865_v4  ;;  %vm1253_vm5 = vcmask 130048  }
 0x30e   :  { %vm1254_vm6 = vmmov %vm1253_vm5 }
 0x30f   :  { %vm1255_vm7 = vmmov %vm1253_vm5 }
 0x310   :  { %vm1256_vm8 = vmmov %vm1253_vm5 }
 0x311   :  { %375 = vrot.lane.b32.xlu1 %v373_v15, %s898_s17  ;;  %161 = vrot.lane.b32.xlu0 %v159_v16, %s899_s18  ;;  %v148_v16 = vadd.f32 1.0, %v147_v14  ;;  %vm1257_vm9 = vmmov %vm1253_vm5 }
 0x315   :  { %177 = vrot.lane.b32.xlu1 %v175_v18, %s900_s19  ;;  %193 = vrot.lane.b32.xlu0 %v191_v17, %s901_s20 }
 0x319   :  { %209 = vrot.lane.b32.xlu1 %v207_v20, %s902_s21  ;;  %225 = vrot.lane.b32.xlu0 %v223_v19, %s903_s22 }
 0x31d   :  { %241 = vrot.lane.b32.xlu1 %v239_v22, %s904_s23  ;;  %257 = vrot.lane.b32.xlu0 %v255_v21, %s905_s25 }
 0x321   :  { %273 = vrot.lane.b32.xlu1 %v271_v25, %s906_s26  ;;  %289 = vrot.lane.b32.xlu0 %v287_v24, %s907_s27 }
 0x325   :  { %305 = vrot.lane.b32.xlu1 %v303_v27, %s908_s28  ;;  %321 = vrot.lane.b32.xlu0 %v319_v26, %s909_s2 }
 0x329   :  { %337 = vrot.lane.b32.xlu1 %v335_v33, %s910_s7  ;;  %353 = vrot.lane.b32.xlu0 %v351_v32, %s911_s8 }
 0x32d   :  { %369 = vrot.lane.b32.xlu1 %v367_v34, %s912_s9 }
 0x331   :  { %514 = vrot.lane.b32.xlu1 %v957_v7, %s913_s11 }
 0x367   :  { %v168_v0 = vpop.permute.xlu0 %167  ;;  %v152_v38 = vpop.permute.xlu1 %151 }
 0x368   :  { %v154_v39 = vadd.f32 %v152_v38, %v991_v23 }
 0x36a   :  { %v170_v40 = vadd.f32 %v168_v0, %v154_v39 }
 0x36b   :  { %v200_v41 = vpop.permute.xlu0 %199  ;;  %v184_v43 = vpop.permute.xlu1 %183 }
 0x36c   :  { %v186_v44 = vadd.f32 %v184_v43, %v170_v40 }
 0x36e   :  { %v202_v45 = vadd.f32 %v200_v41, %v186_v44 }
 0x36f   :  { %v232_v46 = vpop.permute.xlu0 %231  ;;  %v216_v47 = vpop.permute.xlu1 %215 }
 0x370   :  { %v218_v49 = vadd.f32 %v216_v47, %v202_v45 }
 0x372   :  { %v234_v50 = vadd.f32 %v232_v46, %v218_v49 }
 0x373   :  { %v264_v51 = vpop.permute.xlu0 %263  ;;  %v248_v52 = vpop.permute.xlu1 %247 }
 0x374   :  { %v250_v53 = vadd.f32 %v248_v52, %v234_v50 }
 0x376   :  { %v266_v54 = vadd.f32 %v264_v51, %v250_v53  ;;  %v487_v51 = vsel %vm1253_vm5, %v1008_v28, -inf }
 0x377   :  { %v296_v55 = vpop.permute.xlu0 %295  ;;  %v280_v57 = vpop.permute.xlu1 %279 }
 0x378   :  { %v282_v58 = vadd.f32 %v280_v57, %v266_v54 }
 0x37a   :  { %v298_v59 = vadd.f32 %v296_v55, %v282_v58 }
 0x37b   :  { %v328_v60 = vpop.permute.xlu0 %327  ;;  %v312_v61 = vpop.permute.xlu1 %311 }
 0x37c   :  { %v314_v62 = vadd.f32 %v312_v61, %v298_v59 }
 0x37e   :  { %v330_v63 = vadd.f32 %v328_v60, %v314_v62 }
 0x37f   :  { %v344_v1 = vpop.permute.xlu1 %343  ;;  %v360_v3 = vpop.permute.xlu0 %359 }
 0x380   :  { %v346_v2 = vadd.f32 %v344_v1, %v330_v63 }
 0x382   :  { %v362_v5 = vadd.f32 %v360_v3, %v346_v2 }
 0x383   :  { %v376_v6 = vpop.permute.xlu1 %375  ;;  %v162_v15 = vpop.permute.xlu0 %161 }
 0x384   :  { %v378_v8 = vadd.f32 %v376_v6, %v362_v5  ;;  %v164_v18 = vadd.f32 %v162_v15, %v148_v16 }
 0x386   :  { %382 = vrot.lane.b32.xlu0 %v378_v8, %s869_s10 }
 0x387   :  { %v178_v9 = vpop.permute.xlu1 %177  ;;  %v194_v20 = vpop.permute.xlu0 %193 }
 0x388   :  { %v180_v19 = vadd.f32 %v178_v9, %v164_v18 }
 0x38a   :  { %v196_v22 = vadd.f32 %v194_v20, %v180_v19 }
 0x38b   :  { %v210_v11 = vpop.permute.xlu1 %209  ;;  %v226_v26 = vpop.permute.xlu0 %225 }
 0x38c   :  { %v212_v24 = vadd.f32 %v210_v11, %v196_v22 }
 0x38e   :  { %v228_v27 = vadd.f32 %v226_v26, %v212_v24 }
 0x38f   :  { %v242_v12 = vpop.permute.xlu1 %241  ;;  %v258_v48 = vpop.permute.xlu0 %257 }
 0x390   :  { %v244_v31 = vadd.f32 %v242_v12, %v228_v27 }
 0x392   :  { %v260_v35 = vadd.f32 %v258_v48, %v244_v31 }
 0x393   :  { %v274_v13 = vpop.permute.xlu1 %273  ;;  %v290_v37 = vpop.permute.xlu0 %289 }
 0x394   :  { %v276_v36 = vadd.f32 %v274_v13, %v260_v35 }
 0x396   :  { %v292_v0 = vadd.f32 %v290_v37, %v276_v36 }
 0x397   :  { %v306_v17 = vpop.permute.xlu1 %305  ;;  %v322_v39 = vpop.permute.xlu0 %321 }
 0x398   :  { %v308_v38 = vadd.f32 %v306_v17, %v292_v0 }
 0x39a   :  { %v324_v40 = vadd.f32 %v322_v39, %v308_v38 }
 0x39b   :  { %v338_v21 = vpop.permute.xlu1 %337  ;;  %v354_v43 = vpop.permute.xlu0 %353 }
 0x39c   :  { %v340_v41 = vadd.f32 %v338_v21, %v324_v40 }
 0x39e   :  { %v356_v44 = vadd.f32 %v354_v43, %v340_v41 }
 0x39f   :  { %v370_v25 = vpop.permute.xlu1 %369 }
 0x3a0   :  { %v372_v45 = vadd.f32 %v370_v25, %v356_v44 }
 0x3a2   :  { %v379_v46 = vmul.f32 %v372_v45, %v1027_v42 }
 0x3a3   :  { %v515_v29 = vpop.permute.xlu1 %514 }
 0x3a4   :  { %v380_v47 = vadd.f32 1.0, %v379_v46 }
 0x3a5   :  { %120 = vmax.xlane.f32.xlu0 %v119_v10 }
 0x3ce   :  { %v586_v30 = vpop.f32.mrb[2].mxu1 }
 0x3cf   :  { %v587_v32 = vadd.f32 %v586_v30, %v515_v29  ;;  %v758_v33 = vpop.f32.mrb[3].mxu1 }
 0x3d1   :  { %v590_v34 = vmax.f32 %v587_v32, 0.0 }
 0x3d3   :  { %768 = vmatmul.mubr.msk.f32.vlgmr.msra.gmra.mrb[2].mxu0 %vm413_vm2, %v590_v34 }
 0x3f8   :  { %v383_v49 = vpop.permute.xlu0 %382 }
 0x3f9   :  { %vm385_vm4 = vcmp.gt.f32.partialorder %v380_v47, %v383_v49 }
 0x3fa   :  { %v386_v50 = vsel %vm385_vm4, 1.0, %v865_v4 }
 0x3fb   :  { %394 = vrot.lane.b32.xlu1 %v386_v50, %s885_s30  ;;  %388 = vrot.lane.b32.xlu0 %v386_v50, %s899_s18 }
 0x41f   :  { %488 = vmax.xlane.f32.xlu1 %v487_v51 }
 0x432   :  { %v121_v52 = vpop.xlane.xlu0 %120 }
 0x433   :  { %v122_v53 = vsub.f32 %v991_v23, %v121_v52 }
 0x435   :  { %v123_v54 = vmul.f32 1.442695, %v122_v53 }
 0x437   :  { %851 = vpow2.f32 %v123_v54 }
 0x441   :  { %v852_v55 = vpop.eup %851 }
 0x442   :  { %126 = vrot.lane.b32.xlu1 %v852_v55, %s866_s24 }
 0x46d   :  { %v395_v42 = vpop.permute.xlu1 %394  ;;  %v389_v58 = vpop.permute.xlu0 %388 }
 0x46e   :  { %v397_v57 = vmul.f32 %v395_v42, %v991_v23  ;;  %v391_v59 = vsel %vm1254_vm6, %v389_v58, 0.0 }
 0x470   :  { %399 = vrot.lane.b32.xlu0 %v397_v57, %s866_s24  ;;  %s915_s24 = smov 16  }
 0x48f   :  { %392 = vadd.xlane.f32.xlu0 %v391_v59 }
 0x4a6   :  { %v663_v60 = vpop.f32.mrb[2].mxu0 }
 0x4a7   :  { %v769_v61 = vpop.f32.mrb[3].mxu0 }
 0x4ac   :  { %v489_v62 = vpop.xlane.xlu1 %488 }
 0x4ad   :  { %v490_v63 = vsub.f32 %v1008_v28, %v489_v62 }
 0x4af   :  { %v491_v1 = vmul.f32 1.442695, %v490_v63 }
 0x4b1   :  { %853 = vpow2.f32 %v491_v1 }
 0x4b4   :  { %v127_v2 = vpop.permute.xlu1 %126 }
 0x4b5   :  { %v130_v3 = vsel %vm1255_vm7, %v127_v2, 0.0 }
 0x4b6   :  { %131 = vadd.xlane.f32.xlu0 %v130_v3 }
 0x4bb   :  { %v854_v5 = vpop.eup %853 }
 0x4bc   :  { %v493_v6 = vsel %vm1256_vm8, %v854_v5, 0.0 }
 0x4bd   :  { %494 = vadd.xlane.f32.xlu1 %v493_v6 }
 0x4ce   :  { %591 = vrot.lane.b32.xlu1 %v957_v7, %s914_s1 }
 0x4e2   :  { %v400_v8 = vpop.permute.xlu0 %399 }
 0x4e3   :  { %v402_v9 = vsel %vm1257_vm9, %v400_v8, 0.0 }
 0x4e4   :  { %403 = vadd.xlane.f32.xlu0 %v402_v9 }
 0x51c   :  { %v393_v10 = vpop.xlane.xlu0 %392 }
 0x543   :  { %v132_v28 = vpop.xlane.xlu0 %131 }
 0x544   :  { %855 = vrcp.f32 %v132_v28 }
 0x54a   :  { %v495_v11 = vpop.xlane.xlu1 %494 }
 0x54b   :  { %857 = vrcp.f32 %v495_v11 }
 0x54e   :  { %v856_v12 = vpop.eup %855  ;;  %v592_v13 = vpop.permute.xlu1 %591 }
 0x54f   :  { %v664_v14 = vadd.f32 %v663_v60, %v592_v13  ;;  %v134_v15 = vmul.f32 %v856_v12, %v852_v55 }
 0x551   :  { %v667_v16 = vmul.f32 0.5, %v664_v14  ;;  %678 = vrot.lane.b32.xlu1 %v134_v15, %s915_s24 }
 0x553   :  { %859 = vtanh.f32 %v667_v16 }
 0x554   :  { %861 = vrcp.f32 %v393_v10 }
 0x555   :  { %v858_v17 = vpop.eup %857 }
 0x556   :  { %v497_v18 = vmul.f32 %v858_v17, %v854_v5 }
 0x558   :  { %673 = vrot.lane.b32.xlu0 %v497_v18, %s914_s1 }
 0x55c   :  { %689 = vrot.lane.b32.xlu0 %v1067_v56, %s867_s5 }
 0x55d   :  { %v860_v7 = vpop.eup %859 }
 0x55e   :  { %v669_v19 = vadd.f32 1.0, %v860_v7  ;;  %v862_v24 = vpop.eup %861 }
 0x560   :  { %v670_v20 = vmul.f32 0.5, %v669_v19 }
 0x562   :  { %671 = vst.msk [vmem:[%s1251_s3] sm:$0xff] %vm413_vm2, %v670_v20  ;;  %vm687_vm2 = vcmask 654848  }
 0x571   :  { %v404_v21 = vpop.xlane.xlu0 %403 }
 0x572   :  { %v702_v22 = vadd.f32 -1.0, %v404_v21 }
 0x574   :  { %v407_v25 = vmul.f32 %v862_v24, %v702_v22 }
 0x576   :  { %v408_v26 = vsub.f32 %v991_v23, %v407_v25 }
 0x578   :  { %v409_v27 = vmax.f32 %v408_v26, 0.0 }
 0x57a   :  { %684 = vrot.lane.b32.xlu1 %v409_v27, %s914_s1 }
 0x5c3   :  { %v679_v29 = vpop.permute.xlu1 %678 }
 0x5ca   :  { %v674_v56 = vpop.permute.xlu0 %673 }
 0x5cb   :  { %676 = vst.msk [vmem:[%s1251_s3] sm:$0xff] %vm118_vm3, %v674_v56 }
 0x5cc   :  { %682 = vst.msk [vmem:[%s1251_s3] sm:$0xff] %vm681_vm10, %v679_v29 }
 0x5ce   :  { %v690_v23 = vpop.permute.xlu0 %689 }
 0x5ec   :  { %v685_v30 = vpop.permute.xlu1 %684 }
 0x5ed   :  { %688 = vst.msk [vmem:[%s1251_s3] sm:$0xff] %vm687_vm2, %v685_v30 }
 0x5ee   :  { %693 = vst.msk [vmem:[%s1251_s3] sm:$0xff] %vm692_vm11, %v690_v23 }
 0x5ef   :  { %695 = vst.msk [vmem:[%s1251_s3] sm:$0xff] %vm694_vm12, %v865_v4 }

</bundles_post_ra>
